<compile_context>
chip_gen: v7x
topology: tpu7x:2x2x1
jax: 0.10.0
libtpu: 0.0.40
codegen_flags: <defaults>
</compile_context>

<pallas_src>
import jax
import jax.numpy as jnp
from jax.experimental import pallas as pl
from jax.experimental.pallas import tpu as pltpu


def basic_block_kernel(x_ref, w1_ref, w2_ref, o_ref):
    # x_ref/o_ref: (C, tl) -- channels on sublanes, spatial on lanes.
    # w1_ref/w2_ref: (C, C) conv1x1 weights laid out (C_out, C_in); y = W @ x.
    x = x_ref[...]
    h = jnp.dot(w1_ref[...], x, preferred_element_type=jnp.float32)
    h = jnp.maximum(h, 0.0).astype(x.dtype)        # bn1 = Identity; ReLU; back to MXU dtype
    y = jnp.dot(w2_ref[...], h, preferred_element_type=jnp.float32)
    y = y + x.astype(jnp.float32)                  # bn2 = Identity; residual add in f32
    o_ref[...] = jnp.maximum(y, 0.0).astype(o_ref.dtype)


def _pick_spatial_tile(hw: int, max_tile: int = 2048) -> int:
    """Largest lane-dense spatial tile (multiple of 128) dividing hw, capped at
    max_tile. Falls back to the full spatial extent (block_shape == full dim is
    always legal) when no such divisor exists."""
    if hw <= max_tile:
        return hw
    for t in range(max_tile, 127, -128):
        if hw % t == 0:
            return t
    # TODO(synk): add a masked remainder tile for pathological H*W instead of
    # one full-extent block.
    return hw


def basic_block_1x1(x_nchw, w1, w2, *, max_tile=2048):
    """x_nchw: (N, C, H, W). w1, w2: conv1x1 weights of shape (C, C, 1, 1)."""
    N, C, H, W = x_nchw.shape
    HW = H * W
    tl = _pick_spatial_tile(HW, max_tile)
    assert HW % tl == 0

    # Free reshape: NCHW already has channels-on-sublane / spatial-on-lane.
    x3 = x_nchw.reshape(N, C, HW)

    # Conv1x1 weight (C_out, C_in, 1, 1) -> (C_out, C_in). y = W @ x needs no
    # transpose; cast once here, never inside the kernel per grid step.
    w1_mat = w1[:, :, 0, 0].astype(x_nchw.dtype)
    w2_mat = w2[:, :, 0, 0].astype(x_nchw.dtype)

    itemsize = jnp.dtype(x_nchw.dtype).itemsize
    # Double-buffered x/out tiles + two resident (C, C) weights, 4x headroom;
    # clamp to [16 MiB, 48 MiB] so it always fits v7x's 64 MiB physical VMEM.
    vmem_need = 2 * 2 * C * tl * itemsize + 2 * C * C * itemsize
    vmem_limit = min(max(4 * vmem_need, 16 * 1024 * 1024), 48 * 1024 * 1024)

    out3 = pl.pallas_call(
        basic_block_kernel,
        out_shape=jax.ShapeDtypeStruct((N, C, HW), x_nchw.dtype),
        grid_spec=pltpu.PrefetchScalarGridSpec(
            num_scalar_prefetch=0,
            grid=(N, HW // tl),
            in_specs=[
                pl.BlockSpec((pl.Squeezed(), C, tl), lambda n, i: (n, 0, i)),
                pl.BlockSpec((C, C), lambda n, i: (0, 0)),  # resident weights
                pl.BlockSpec((C, C), lambda n, i: (0, 0)),
            ],
            out_specs=pl.BlockSpec((pl.Squeezed(), C, tl), lambda n, i: (n, 0, i)),
        ),
        compiler_params=pltpu.CompilerParams(
            dimension_semantics=("parallel", "parallel"),
            vmem_limit_bytes=vmem_limit,
        ),
    )(x3, w1_mat, w2_mat)

    return out3.reshape(N, C, H, W)


def basic_block_1x1_ref(x_nchw, w1, w2):
    """Pure-JAX reference mirroring the PyTorch module."""
    w1_mat = w1[:, :, 0, 0]  # (C_out, C_in)
    w2_mat = w2[:, :, 0, 0]
    out = jnp.einsum("oc,nchw->nohw", w1_mat, x_nchw)
    out = jnp.maximum(out, 0.0)
    out = jnp.einsum("oc,nchw->nohw", w2_mat, out)
    out = out + x_nchw
    return jnp.maximum(out, 0.0)


if __name__ == "__main__":
    # BasicBlock1x1(inplanes=C, planes=C): residual add requires planes == inplanes.
    N, C, H, W = 2, 4, 16, 16
    key = jax.random.PRNGKey(0)
    kx, k1, k2 = jax.random.split(key, 3)

    x = jax.random.normal(kx, (N, C, H, W), dtype=jnp.float32)
    # Deterministic synthetic conv1x1 weights: shape (planes, inplanes, 1, 1).
    w1 = jax.random.normal(k1, (C, C, 1, 1), dtype=jnp.float32) * 0.1
    w2 = jax.random.normal(k2, (C, C, 1, 1), dtype=jnp.float32) * 0.1

    out = jax.block_until_ready(basic_block_1x1(x, w1, w2))
    ref = jax.block_until_ready(basic_block_1x1_ref(x, w1, w2))

    assert out.shape == (N, C, H, W)
    assert jnp.allclose(out, ref, atol=1e-5, rtol=1e-5), "mismatch vs reference"
    print("KERNEL_OK")
</pallas_src>

<mosaic_0001>
module attributes {stable_mosaic.version = 11 : i64} {
  func.func @basic_block_kernel(%arg0: i32, %arg1: i32, %arg2: memref<1x4x256xf32, #tpu.memory_space<vmem>>, %arg3: memref<4x4xf32, #tpu.memory_space<vmem>>, %arg4: memref<4x4xf32, #tpu.memory_space<vmem>>, %arg5: memref<1x4x256xf32, #tpu.memory_space<vmem>>) attributes {dimension_semantics = [#tpu.dimension_semantics<parallel>, #tpu.dimension_semantics<parallel>], iteration_bounds = array<i64: 2, 1>, scalar_prefetch = 0 : i64, scratch_operands = 0 : i64, tpu.core_type = #tpu.core_type<tc>, window_params = [{transform_indices = @transform_0, window_bounds = array<i64: 1, 4, 256>}, {pipeline_mode = #tpu.pipeline_mode<synchronous>, transform_indices = @transform_1, window_bounds = array<i64: 4, 4>}, {pipeline_mode = #tpu.pipeline_mode<synchronous>, transform_indices = @transform_2, window_bounds = array<i64: 4, 4>}, {transform_indices = @transform_3, window_bounds = array<i64: 1, 4, 256>}]} {
    %c0 = arith.constant 0 : index
    %c0_0 = arith.constant 0 : index
    %c0_1 = arith.constant 0 : index
    %0 = vector.load %arg2[%c0, %c0_0, %c0_1] : memref<1x4x256xf32, #tpu.memory_space<vmem>>, vector<1x4x256xf32>
    %1 = vector.shape_cast %0 : vector<1x4x256xf32> to vector<4x256xf32>
    %c0_2 = arith.constant 0 : index
    %c0_3 = arith.constant 0 : index
    %2 = vector.load %arg3[%c0_2, %c0_3] : memref<4x4xf32, #tpu.memory_space<vmem>>, vector<4x4xf32>
    %cst = arith.constant dense<0.000000e+00> : vector<4x256xf32>
    %3 = tpu.matmul %2, %1, %cst {dimension_numbers = #tpu.dot_dimension_numbers<[1], [0], [0], [1], [0, 0, 1, 1], [], []>} : vector<4x4xf32>, vector<4x256xf32>, vector<4x256xf32> -> vector<4x256xf32>
    %cst_4 = arith.constant 0.000000e+00 : f32
    %4 = vector.broadcast %cst_4 : f32 to vector<4x256xf32>
    %5 = arith.maximumf %3, %4 : vector<4x256xf32>
    %c0_5 = arith.constant 0 : index
    %c0_6 = arith.constant 0 : index
    %6 = vector.load %arg4[%c0_5, %c0_6] : memref<4x4xf32, #tpu.memory_space<vmem>>, vector<4x4xf32>
    %cst_7 = arith.constant dense<0.000000e+00> : vector<4x256xf32>
    %7 = tpu.matmul %6, %5, %cst_7 {dimension_numbers = #tpu.dot_dimension_numbers<[1], [0], [0], [1], [0, 0, 1, 1], [], []>} : vector<4x4xf32>, vector<4x256xf32>, vector<4x256xf32> -> vector<4x256xf32>
    %8 = arith.addf %7, %1 : vector<4x256xf32>
    %cst_8 = arith.constant 0.000000e+00 : f32
    %9 = vector.broadcast %cst_8 : f32 to vector<4x256xf32>
    %10 = arith.maximumf %8, %9 : vector<4x256xf32>
    %c0_9 = arith.constant 0 : index
    %c0_10 = arith.constant 0 : index
    %c0_11 = arith.constant 0 : index
    %11 = vector.load %arg5[%c0_9, %c0_10, %c0_11] : memref<1x4x256xf32, #tpu.memory_space<vmem>>, vector<1x4x256xf32>
    %12 = vector.shape_cast %11 : vector<1x4x256xf32> to vector<4x256xf32>
    %13 = vector.shape_cast %10 : vector<4x256xf32> to vector<1x4x256xf32>
    tpu.vector_store %arg5[%c0_9, %c0_10, %c0_11], %13 {strides = array<i32>} : memref<1x4x256xf32, #tpu.memory_space<vmem>>, vector<1x4x256xf32>,
    return
  }
  func.func @transform_0(%arg0: i32, %arg1: i32) -> (i32, i32, i32) {
    %c0_i32 = arith.constant 0 : i32
    %c0_i32_0 = arith.constant 0 : i32
    return %arg0, %c0_i32, %arg1 : i32, i32, i32
  }
  func.func @transform_1(%arg0: i32, %arg1: i32) -> (i32, i32) {
    %c0_i32 = arith.constant 0 : i32
    %c0_i32_0 = arith.constant 0 : i32
    %c0_i32_1 = arith.constant 0 : i32
    return %c0_i32, %c0_i32_0 : i32, i32
  }
  func.func @transform_2(%arg0: i32, %arg1: i32) -> (i32, i32) {
    %c0_i32 = arith.constant 0 : i32
    %c0_i32_0 = arith.constant 0 : i32
    %c0_i32_1 = arith.constant 0 : i32
    return %c0_i32, %c0_i32_0 : i32, i32
  }
  func.func @transform_3(%arg0: i32, %arg1: i32) -> (i32, i32, i32) {
    %c0_i32 = arith.constant 0 : i32
    %c0_i32_0 = arith.constant 0 : i32
    return %arg0, %c0_i32, %arg1 : i32, i32, i32
  }
}

</mosaic_0001>

<bundles_post_ra>
// kernel: tpu_custom_call.1
= control target key start
LH: loop header
LB: loop body
LE: loop exit
PB: predicated region body
PF: predicated region fallthrough
CT: control target
= control target key end

     0   :  { %8 = vsyncpa [#allocation3], 0  ;;  %s999_s0 = inlined_call_operand.hbm [shape: f32[2,4,256], index: 0, kind: input, shape index: {}]   ;;  %s1000_s1 = inlined_call_operand.hbm [shape: f32[4,4], index: 1, kind: input, shape index: {}]   ;;  %s1001_s2 = inlined_call_operand.vmem [shape: f32[4,4], index: 2, kind: input, shape index: {}]   ;;  %s1002_s3 = inlined_call_operand.hbm [shape: f32[2,4,256], index: 3, kind: output, shape index: {}]  }
   0x1   :  { %10 = vsyncpa [#allocation3 + $0x1], 0 }
   0x2   :  { %11 = vsyncpa [#allocation6], 0 }
   0x3   :  { %12 = vsyncpa [#allocation4], 0 }
   0x4   :  { %14 = vsyncpa [#allocation4 + $0x1], 0  ;;  %s776_s12 = smov 0   ;;  %s778_s13 = smov 0  }
   0x5   :  { %s780_s14 = smov 0   ;;  %s782_s15 = smov 0  }
   0x6   :  { %s784_s16 = smov 0   ;;  %s786_s17 = smov 0  }
   0x7 LB: > { %s506_s18 = sadd.s32 4294967295, %s750_s17   ;;  %s507_s19 = sadd.s32 4294967294, %s750_s17   ;;  %s750_s17 = sphi %s786_s17, %s20_s17   ;;  %s746_s16 = sphi %s784_s16, %s1027_s16   ;;  %s742_s15 = sphi %s782_s15, %s1026_s15   ;;  %s738_s14 = sphi %s780_s14, %s1025_s14   ;;  %s734_s13 = sphi %s778_s13, %s1024_s13   ;;  %s730_s12 = sphi %s776_s12, %s1023_s12  }
   0x8   : > { %p54_p0 = scmp.ne.s32.totalorder %s734_s13, %s730_s12  ;;  %p810_p1 = scmp.eq.s32.totalorder %s506_s18, 0 }
   0x9   : > { %p814_p2 = scmp.eq.s32.totalorder %s506_s18, 1  ;;  %p128_p3 = scmp.eq.s32.totalorder %s507_s19, 1 }
   0xa   : > { %s1007_s20 = scalar_select %p810_p1, 1, 0 }
   0xb   : > { %s1008_s21 = scalar_select %p814_p2, 1, 0 }
   0xc   : > { %p820_p4 = por %p810_p1, %p54_p0  ;;  %p508_p5 = scmp.ge.s32.totalorder %s750_s17, 1 }
   0xd   : > { %p825_p6 = por %p128_p3, %p54_p0  ;;  %p135_p7 = scmp.lt.s32.totalorder %s750_s17, 3 }
   0xe   : > { %s1009_s22 = scalar_select %p820_p4, 1, 0 }
   0xf   : > { %s1010_s23 = scalar_select %p825_p6, 1, 0 }
  0x10   : > { %p830_p8 = pnand %p508_p5, %p135_p7  ;;  %s752_s25 = smov [#allocation5]  }
  0x11   : > { %s148_s26 = sshll.u32 %s752_s25, 4  ;;  %s32_s28 = sadd.s32 1, %s746_s16  ;;  %s149_s26 = int_to_ptr.vmem [resolvable:$true] %s148_s26 }
  0x12   : > { %s1011_s24 = scalar_select %p830_p8, 1, 0 }
  0x13   : > { %p539_p10 = pneg %p830_p8  ;;  %s41_s29 = sadd.s32 1, %s738_s14 }
  0x14   : > { %p845_p12 = scmp.ge.s32.totalorder %s32_s28, 2  ;;  %s606_s6 = scalar_lea.hbm %s1000_s1, 64 }
  0x15   : > { %p839_p11 = pnand %p539_p10, %p810_p1  ;;  %p607_p13 = scmp.ne.s32.totalorder %s1000_s1, %s606_s6 }
  0x16   : > { %s1013_s30 = scalar_select %p845_p12, 1, 0 }
  0x17   : > { %p608_p0 = pneg %p839_p11  ;;  %p613_p7 = scmp.lt.u32.totalorder %s606_s6, %s1000_s1 }
  0x19   : > { %p609_p3 = pnand %p608_p0, %p607_p13 }
  0x1b   : > { %p610_p5 = pneg %p609_p3 }
  0x1d   : > { %p615_p10 = pnand %p613_p7, %p610_p5 }
  0x1f   : > { %618 = shalt.err (!%p615_p10)
}
  0x20   : > { %s619_s11 = scalar_lea.vmem %s149_s26, 64  ;;  %p627_p4 = scmp.lt.s32.totalorder %s149_s26, %s149_s26 }
  0x21   : > { %p620_p9 = scmp.ne.s32.totalorder %s149_s26, %s619_s11  ;;  %p628_p8 = scmp.lt.s32.totalorder %s619_s11, %s619_s11 }
  0x23   : > { %p622_p6 = pnand %p620_p9, %p608_p0  ;;  %p629_p2 = por %p628_p8, %p627_p4 }
  0x25   : > { %p623_p1 = pneg %p622_p6 }
  0x27   : > { %p630_p12 = pnand %p629_p2, %p623_p1 }
  0x29   : > { %633 = shalt.err (!%p630_p12)
}
  0x2a   : > { %542 = dma.hbm_to_vmem [thread:$0]  (!%p839_p11), %s1000_s1, 64, %s149_s26, [#allocation6]  }
  0x2b   : > { %p1014_p4 = scmp.ne.s32.totalorder %s1013_s30, 0  ;;  %p48_p1 = scmp.ne.s32.totalorder %s738_s14, %s734_s13 }
  0x2c   : > { %p49_p2 = scmp.eq.s32.totalorder %s750_s17, 0  ;;  %p552_p6 = scmp.lt.s32.totalorder %s750_s17, 2 }
  0x2d   : > { %s1029_s28 = smov (%p1014_p4, %s32_s28), 0  ;;  %p1015_p12 = scmp.ne.s32.totalorder %s1008_s21, 0 }
  0x2e   : > { %s36_s25 = ssub.s32 %s746_s16, %s1029_s28  ;;  %p50_p9 = por %p49_p2, %p48_p1 }
  0x2f   : > { %p39_p8 = scmp.eq.s32.totalorder %s36_s25, 0  ;;  %p877_p13 = por %p1015_p12, %p48_p1 }
  0x30   : > { %s162_s4 = sand.u32 1, %s738_s14   ;;  %s529_s30 = sshll.u32 %s746_s16, 7 }
  0x31   : > { %s885_s5 = scalar_select %p39_p8, %s738_s14, %s41_s29  }
  0x32   : > { %s511_s26 = sshll.u32 %s162_s4, 3  ;;  %s891_s8 = scalar_lea.hbm %s999_s0, %s529_s30 }
  0x33   : > { %s166_s21 = scalar_lea.vmem [#allocation2], %s511_s26  ;;  %p895_p11 = pnand %p552_p6, %p50_p9 }
  0x34   : > { %s176_s9 = sshll.u32 %s166_s21, 4  ;;  %s163_s29 = scalar_lea.sflag [#allocation3], %s162_s4  ;;  %s893_s9 = int_to_ptr.vmem [resolvable:$true] %s176_s9 }
  0x35   : > { %s634_s11 = scalar_lea.hbm %s891_s8, 128  ;;  %p636_p3 = pneg %p895_p11 }
  0x36   : > { %p635_p0 = scmp.ne.s32.totalorder %s891_s8, %s634_s11  ;;  %s639_s25 = scalar_lea.hbm %s999_s0, 256 }
  0x37   : > { %p640_p10 = scmp.lt.u32.totalorder %s891_s8, %s999_s0  ;;  %p641_p4 = scmp.lt.u32.totalorder %s639_s25, %s634_s11 }
  0x38   : > { %p637_p5 = pnand %p636_p3, %p635_p0  ;;  %p643_p2 = scmp.lt.u32.totalorder %s634_s11, %s891_s8 }
  0x39   : > { %p642_p1 = por %p641_p4, %p640_p10 }
  0x3a   : > { %p638_p7 = pneg %p637_p5 }
  0x3b   : > { %p644_p6 = por %p643_p2, %p642_p1 }
  0x3d   : > { %p645_p8 = pnand %p644_p6, %p638_p7 }
  0x3f   : > { %648 = shalt.err (!%p645_p8)
}
  0x40   : > { %s649_s4 = scalar_lea.vmem %s893_s9, 128  ;;  %s753_s6 = smov [#allocation2]  }
  0x41   : > { %p650_p9 = scmp.ne.s32.totalorder %s893_s9, %s649_s4  ;;  %s654_s7 = sshll.u32 %s753_s6, 4  ;;  %s655_s7 = int_to_ptr.vmem [resolvable:$false] %s654_s7 }
  0x42   : > { %s656_s21 = scalar_lea.vmem %s655_s7, 256  ;;  %p657_p5 = scmp.lt.s32.totalorder %s893_s9, %s655_s7 }
  0x43   : > { %p652_p12 = pnand %p650_p9, %p636_p3  ;;  %p658_p10 = scmp.lt.s32.totalorder %s656_s21, %s649_s4 }
  0x45   : > { %p653_p0 = pneg %p652_p12  ;;  %p659_p4 = por %p658_p10, %p657_p5 }
  0x47   : > { %p660_p1 = pnand %p659_p4, %p653_p0 }
  0x49   : > { %663 = shalt.err (!%p660_p1)
}
  0x4a   : > { %546 = dma.hbm_to_vmem [thread:$0]  (!%p895_p11), %s891_s8, 128, %s893_s9, %s163_s29  }
  0x4b   : > { %p1018_p7 = scmp.ne.s32.totalorder %s1011_s24, 0 }
  0x4c   : > { %s927_s11 = sand.u32 (!%p1018_p7), 1, %s734_s13   ;;  %p1019_p3 = scmp.ne.s32.totalorder (!%p1018_p7), %s1009_s22, 0 }
  0x4d   : > { %185 = sbr.rel (%p1018_p7) target bundleno = 543 (0x21f), region = 32  ;;  %s515_s18 = sshll.u32 (!%p1018_p7), %s927_s11, 3 }
  0x4e   : > { %s188_s19 = scalar_lea.sflag (!%p1018_p7), [#allocation3], %s927_s11  ;;  %s191_s25 = scalar_lea.vmem (!%p1018_p7), [#allocation2], %s515_s18 }
  0x54   : > { %717 = dma.done.wait (%p1019_p3), %s188_s19, 128  }
  0x55   : > { %719 = vsyncadd (%p1019_p3), %s188_s19, 4294967168  ;;  %p1020_p11 = scmp.ne.s32.totalorder %s1007_s20, 0 }
  0x57   : > { %721 = dma.done.wait (%p1020_p11), [#allocation6], 64  }
  0x58   : > { %723 = vsyncadd (%p1020_p11), [#allocation6], 4294967232  ;;  %v754_v0 = vmov 0.0   ;;  %v220_v1 = vld [vmem:[%s191_s25] sm:$0xff]  ;;  %vm228_vm0 = vcmask 1043456   ;;  %vm224_vm1 = vcmask 31744  }
  0x59   : > { %297 = vmatprep.mubr.f32.mxu0 %v754_v0  ;;  %381 = vmatprep.mubr.f32.mxu1 %v754_v0  ;;  %v223_v2 = vcombine.high %v220_v1, %v220_v1  ;;  %v221_v3 = vld [vmem:[#allocation5] sm:$0xf]  ;;  %v306_v8 = vld [vmem:[%s1001_s2] sm:$0xf]  ;;  %s530_s24 = sshll.u32 %s742_s15, 7  ;;  %s217_s8 = scalar_lea.vmem [#allocation7], %s515_s18 }
  0x5a   : > { %s412_s9 = sshll.u32 %s217_s8, 4  ;;  %s950_s26 = scalar_lea.hbm %s1002_s3, %s530_s24  ;;  %s952_s9 = int_to_ptr.vmem [resolvable:$true] %s412_s9 }
  0x5b   : > { %518 = vmatprep.subr.msk.mxu0 %vm228_vm0, %v223_v2  ;;  %s396_s30 = scalar_lea.sflag [#allocation4], %s927_s11  ;;  %s664_s4 = scalar_lea.vmem %s952_s9, 128 }
  0x5c   : > { %519 = vmatpush1.msk.msra.mxu0 %vm228_vm0, %v220_v1  ;;  %p665_p2 = scmp.ne.s32.totalorder %s952_s9, %s664_s4  ;;  %s755_s15 = smov [#allocation7]  }
  0x5d   : > { %520 = vmatmul.mubr.msk.f32.vlgmr.msra.gmra.mrb[0].mxu0 %vm224_vm1, %v221_v3  ;;  %s668_s6 = sshll.u32 %s755_s15, 4  ;;  %s669_s6 = int_to_ptr.vmem [resolvable:$false] %s668_s6 }
  0x5e   : > { %p666_p6 = pnand %p665_p2, %p877_p13  ;;  %s670_s7 = scalar_lea.vmem %s669_s6, 256 }
  0x5f   : > { %p671_p9 = scmp.lt.s32.totalorder %s952_s9, %s669_s6  ;;  %p672_p12 = scmp.lt.s32.totalorder %s670_s7, %s664_s4 }
  0x60   : > { %p667_p8 = pneg %p666_p6 }
  0x61   : > { %p673_p0 = por %p672_p12, %p671_p9 }
  0x63   : > { %p674_p5 = pnand %p673_p0, %p667_p8 }
 0x130   : > { %v299_v4 = vpop.f32.mrb[0].mxu0 }
 0x131   : > { %v301_v5 = vpop.f32.mrb[1].mxu0  ;;  %v304_v7 = vmax.f32 %v299_v4, 0.0 }
 0x132   : > { %v305_v6 = vmax.f32 %v301_v5, 0.0 }
 0x134   : > { %521 = vmatprep.subr.msk.mxu1 %vm228_vm0, %v305_v6 }
 0x135   : > { %522 = vmatpush1.msk.msra.mxu1 %vm228_vm0, %v304_v7 }
 0x136   : > { %523 = vmatmul.mubr.msk.f32.vlgmr.msra.gmra.mrb[0].mxu1 %vm224_vm1, %v306_v8 }
 0x209   : > { %v383_v9 = vpop.f32.mrb[0].mxu1 }
 0x20a   : > { %v384_v10 = vadd.f32 %v383_v9, %v220_v1  ;;  %v385_v11 = vpop.f32.mrb[1].mxu1 }
 0x20b   : > { %v386_v12 = vadd.f32 %v385_v11, %v223_v2 }
 0x20c   : > { %v388_v13 = vmax.f32 %v384_v10, 0.0 }
 0x20d   : > { %v389_v14 = vmax.f32 %v386_v12, 0.0 }
 0x20f   : > { %v392_v15 = vcombine.low %v388_v13, %v389_v14 }
 0x211   : > { %394 = vst [vmem:[%s217_s8] sm:$0xff] %v392_v15 }
 0x212   : > { %677 = shalt.err (!%p674_p5)
}
 0x213   : > { %s678_s21 = scalar_lea.hbm %s950_s26, 128  ;;  %s682_s19 = scalar_lea.hbm %s1002_s3, 256 }
 0x214   : > { %p679_p10 = scmp.ne.s32.totalorder %s950_s26, %s678_s21  ;;  %p683_p7 = scmp.lt.u32.totalorder %s950_s26, %s1002_s3 }
 0x215   : > { %p684_p3 = scmp.lt.u32.totalorder %s682_s19, %s678_s21  ;;  %p686_p2 = scmp.lt.u32.totalorder %s678_s21, %s950_s26 }
 0x216   : > { %p680_p4 = pnand %p679_p10, %p877_p13 }
 0x217   : > { %p685_p11 = por %p684_p3, %p683_p7 }
 0x218   : > { %p681_p1 = pneg %p680_p4 }
 0x219   : > { %p687_p6 = por %p686_p2, %p685_p11 }
 0x21b   : > { %p688_p8 = pnand %p687_p6, %p681_p1 }
 0x21d   : > { %691 = shalt.err (!%p688_p8)
}
 0x21e   : > { %537 = dma.vmem_to_hbm [thread:$0]  (%p877_p13), %s952_s9, 128, %s950_s26, %s396_s30  }
 0x21f PF: > { %s424_s20 = sand.u32 1, %s730_s12   ;;  %p1021_p9 = scmp.ne.s32.totalorder %s1010_s23, 0 }
 0x220   : > { %p1022_p12 = scmp.ge.s32.totalorder %s750_s17, 2  ;;  %s425_s24 = scalar_lea.sflag [#allocation4], %s424_s20 }
 0x222   : > { %p548_p0 = pnand %p1022_p12, %p1021_p9 }
 0x224   : > { %725 = dma.done.wait (!%p548_p0), %s425_s24, 128  }
 0x225   : > { %727 = vsyncadd (!%p548_p0), %s425_s24, 4294967168  ;;  %s20_s17 = sadd.s32 1, %s750_s17   ;;  %s1023_s12 = smov %s734_s13 }
 0x226   : > { %p17_p5 = scmp.ge.s32.totalorder %s20_s17, 4   ;;  %s1024_s13 = smov %s738_s14 }
 0x227   : > { %s1025_s14 = smov %s885_s5  ;;  %s1026_s15 = smov %s746_s16 }
 0x228   : > { %s1027_s16 = smov %s1029_s28  ;;  %19 = sbr.rel (!%p17_p5) target bundleno = 7 (0x7), region = 81 }
 0x22f   :  { %430 = vsyncpa [#allocation3], 1 }
 0x230   :  { %432 = vsyncpa [#allocation3 + $0x1], 1 }
 0x231   :  { %433 = vsyncpa [#allocation6], 1 }
 0x232   :  { %434 = vsyncpa [#allocation4], 1 }
 0x233   :  { %436 = vsyncpa [#allocation4 + $0x1], 1 }

</bundles_post_ra>
